<compile_context>
chip_gen: v7x
topology: tpu7x:2x2x1
jax: 0.10.0
libtpu: 0.0.40
codegen_flags: <defaults>
</compile_context>

<pallas_src>
import jax
import jax.numpy as jnp
import numpy as np
from jax.experimental import pallas as pl
from jax.experimental.pallas import tpu as pltpu


_LANE = 128                  # vreg lane width
_SUB = 8                     # vreg sublane count
_STEP_ELEMS = 512 * 1024     # ~2 MiB of f32 per input array per grid step


def _choose_tiles(B, C, L):
    """Pick (TB, TL) = (batch rows, flattened-spatial lanes) per grid step.

    Invariants (Mosaic (8, 128) block rules):
      * TB == B (full)  or  TB % 8 == 0
      * TL == L (full)  or  TL % 128 == 0
    and TB*C*TL stays around _STEP_ELEMS so the double-buffered working set
    fits the default scoped VMEM on v5e / v6e / v7x.
    """
    if B * C * L <= _STEP_ELEMS:              # whole problem in a single grid step
        return B, L
    TB = B if B <= _SUB else _SUB
    TL = _STEP_ELEMS // max(TB * C, 1)
    if TL >= L:
        TL = L
        # Room for more batch rows: grow TB in sublane multiples.
        more = (_STEP_ELEMS // (C * L)) // _SUB * _SUB
        TB = max(TB, min((B // _SUB) * _SUB, more))
    else:
        TL = max(_LANE, (TL // _LANE) * _LANE)
    return TB, TL


def _pad_to(x, axis, size):
    pad = size - x.shape[axis]
    if pad <= 0:
        return x
    widths = [(0, 0)] * x.ndim
    widths[axis] = (0, pad)
    return jnp.pad(x, widths)


def _block_partials(x, z, m):
    """x, z: (TB, C, TL); m: (TB, TL)  ->  (num, den), each (TB, 1)."""
    # Bernoulli-with-logits log prob per pixel, summed over the channel axis.
    # softplus(z) = max(z, 0) + log1p(exp(-|z|))   (numerically stable)
    softplus = jnp.maximum(z, 0.0) + jnp.log1p(jnp.exp(-jnp.abs(z)))
    lp = jnp.sum(x * z - softplus, axis=1)                 # (TB, TL)
    num = jnp.sum(lp * m, axis=-1, keepdims=True)          # (TB, 1)
    den = jnp.sum(m, axis=-1, keepdims=True)               # (TB, 1)
    return num, den


def _lpm_kernel(data_ref, logits_ref, mask_ref, out_ref, num_acc, den_acc):
    """Grid = (batch tiles, spatial tiles). Spatial axis is innermost and is
    accumulated into VMEM scratch; the (TB, 1) output block is written once on
    the last spatial tile."""
    l = pl.program_id(1)

    @pl.when(l == 0)
    def _():
        num_acc[...] = jnp.zeros_like(num_acc)
        den_acc[...] = jnp.zeros_like(den_acc)

    x = data_ref[...]                      # (TB, C, TL)
    z = logits_ref[...]                    # (TB, C, TL)
    m = mask_ref[...][:, 0, :]             # (TB, TL)  == mask[..., 0, :, :]

    num, den = _block_partials(x, z, m)
    num_acc[...] += num
    den_acc[...] += den

    @pl.when(l == pl.num_programs(1) - 1)
    def _():
        # Masked mean. Division by the raw mask sum matches the PyTorch
        # semantics (an all-zero mask yields inf/nan there as well).
        out_ref[...] = num_acc[...] / den_acc[...]


def _lpm_mc_kernel(data_ref, logits_ref, mask_ref, out_ref, num_acc, den_acc):
    """MC-mode grid = (bs, mc, spatial tiles). data/mask blocks are resident
    across the mc axis (no jnp.repeat); the (bs*mc, 1) output block stays
    resident in VMEM and each (i, j) writes its own row on the last tile."""
    i = pl.program_id(0)
    j = pl.program_id(1)
    l = pl.program_id(2)

    @pl.when(l == 0)
    def _():
        num_acc[...] = jnp.zeros_like(num_acc)
        den_acc[...] = jnp.zeros_like(den_acc)

    x = data_ref[...]                      # (1, C, TL)
    z = logits_ref[...][:, 0]              # (1, C, TL)
    m = mask_ref[...][:, 0, :]             # (1, TL)

    num, den = _block_partials(x, z, m)
    num_acc[...] += num
    den_acc[...] += den

    @pl.when(l == pl.num_programs(2) - 1)
    def _():
        row = i * pl.num_programs(1) + j
        out_ref[pl.ds(row, 1), :] = num_acc[...] / den_acc[...]


def log_prob_mask(data, logits, mask=None):
    """Pallas equivalent of Likelihood.log_prob_mask(mode='mean', reduce=True)."""
    if logits.ndim == 5:
        return _log_prob_mask_mc(data, logits, mask)

    B, C, H, W = data.shape
    L = H * W
    if mask is None:
        mask = jnp.ones((B, 1, H, W), jnp.float32)

    # Lane-dense layout: flatten spatial dims; keep only mask channel 0.
    data_f = data.reshape(B, C, L).astype(jnp.float32)
    logits_f = logits.reshape(B, C, L).astype(jnp.float32)
    mask_f = mask[:, :1].reshape(B, 1, L).astype(jnp.float32)

    TB, TL = _choose_tiles(B, C, L)
    grid_b = pl.cdiv(B, TB)
    grid_l = pl.cdiv(L, TL)
    B_pad, L_pad = grid_b * TB, grid_l * TL

    # Zero padding is inert: padded lanes carry mask == 0 and padded batch rows
    # are sliced off below.
    data_f = _pad_to(_pad_to(data_f, 0, B_pad), 2, L_pad)
    logits_f = _pad_to(_pad_to(logits_f, 0, B_pad), 2, L_pad)
    mask_f = _pad_to(_pad_to(mask_f, 0, B_pad), 2, L_pad)

    out = pl.pallas_call(
        _lpm_kernel,
        out_shape=jax.ShapeDtypeStruct((B_pad, 1), jnp.float32),
        grid_spec=pltpu.PrefetchScalarGridSpec(
            num_scalar_prefetch=0,
            grid=(grid_b, grid_l),
            in_specs=[
                pl.BlockSpec((TB, C, TL), lambda i, l: (i, 0, l)),
                pl.BlockSpec((TB, C, TL), lambda i, l: (i, 0, l)),
                pl.BlockSpec((TB, 1, TL), lambda i, l: (i, 0, l)),
            ],
            out_specs=pl.BlockSpec((TB, 1), lambda i, l: (i, 0)),
            scratch_shapes=[pltpu.VMEM((TB, 1), jnp.float32),
                            pltpu.VMEM((TB, 1), jnp.float32)],
        ),
        compiler_params=pltpu.CompilerParams(
            dimension_semantics=("parallel", "arbitrary"),
            vmem_limit_bytes=32 * 1024 * 1024),
    )(data_f, logits_f, mask_f)

    return out[:B, 0]


def _log_prob_mask_mc(data, logits, mask):
    """MC mode (5-D logits): grid (bs, mc, spatial); data/mask are NOT repeated."""
    bs, mc, C, H, W = logits.shape
    L = H * W
    if mask is None:
        mask = jnp.ones((bs, 1, H, W), jnp.float32)

    data_f = data.reshape(bs, data.shape[1], L).astype(jnp.float32)
    logits_f = logits.reshape(bs, mc, C, L).astype(jnp.float32)
    mask_f = mask[:, :1].reshape(bs, 1, L).astype(jnp.float32)

    _, TL = _choose_tiles(1, C, L)
    grid_l = pl.cdiv(L, TL)
    L_pad = grid_l * TL

    data_f = _pad_to(data_f, 2, L_pad)
    logits_f = _pad_to(logits_f, 3, L_pad)
    mask_f = _pad_to(mask_f, 2, L_pad)

    out = pl.pallas_call(
        _lpm_mc_kernel,
        out_shape=jax.ShapeDtypeStruct((bs * mc, 1), jnp.float32),
        grid_spec=pltpu.PrefetchScalarGridSpec(
            num_scalar_prefetch=0,
            grid=(bs, mc, grid_l),
            in_specs=[
                pl.BlockSpec((1, C, TL), lambda i, j, l: (i, 0, l)),        # resident over mc
                pl.BlockSpec((1, 1, C, TL), lambda i, j, l: (i, j, 0, l)),
                pl.BlockSpec((1, 1, TL), lambda i, j, l: (i, 0, l)),        # resident over mc
            ],
            # Whole output stays resident in VMEM; each (i, j) writes its row.
            out_specs=pl.BlockSpec((bs * mc, 1), lambda i, j, l: (0, 0)),
            scratch_shapes=[pltpu.VMEM((1, 1), jnp.float32),
                            pltpu.VMEM((1, 1), jnp.float32)],
        ),
        compiler_params=pltpu.CompilerParams(
            dimension_semantics=("arbitrary", "arbitrary", "arbitrary"),
            vmem_limit_bytes=32 * 1024 * 1024),
    )(data_f, logits_f, mask_f)

    return out[:, 0].reshape(bs, mc)


# ----------------------------- pure-JAX references -----------------------------
def _ref_log_prob_mask(data, logits, mask):
    lp = jnp.sum(data * logits - jax.nn.softplus(logits), axis=1)     # (B, H, W)
    m = mask[:, 0]                                                    # (B, H, W)
    return jnp.sum(lp * m, axis=(-1, -2)) / jnp.sum(m, axis=(-1, -2))


def _ref_log_prob_mask_mc(data, logits, mask):
    lp = jnp.sum(data[:, None] * logits - jax.nn.softplus(logits), axis=2)  # (bs, mc, H, W)
    m = mask[:, None, 0]                                                    # (bs, 1, H, W)
    return jnp.sum(lp * m, axis=(-1, -2)) / jnp.sum(m, axis=(-1, -2))


if __name__ == "__main__":
    B, C, H, W = 2, 4, 16, 16
    MC = 3

    key = jax.random.PRNGKey(0)
    k_data, k_logits, k_mask, k_logits_mc = jax.random.split(key, 4)

    data = jax.random.bernoulli(k_data, 0.5, (B, C, H, W)).astype(jnp.float32)
    logits = jax.random.normal(k_logits, (B, C, H, W), dtype=jnp.float32)
    mask = jax.random.bernoulli(k_mask, 0.7, (B, 1, H, W)).astype(jnp.float32)
    # guarantee a non-empty mask per batch element (same precondition as PyTorch)
    mask = mask.at[:, :, 0, 0].set(1.0)

    # 4-D path
    out = jax.block_until_ready(log_prob_mask(data, logits, mask))
    ref = jax.block_until_ready(_ref_log_prob_mask(data, logits, mask))
    np.testing.assert_allclose(np.asarray(out), np.asarray(ref), rtol=1e-5, atol=1e-5)
    assert out.shape == (B,)

    # MC-mode (5-D logits) path — no data/mask repeat inside the wrapper.
    logits_mc = jax.random.normal(k_logits_mc, (B, MC, C, H, W), dtype=jnp.float32)
    out_mc = jax.block_until_ready(log_prob_mask(data, logits_mc, mask))
    ref_mc = jax.block_until_ready(_ref_log_prob_mask_mc(data, logits_mc, mask))
    np.testing.assert_allclose(np.asarray(out_mc), np.asarray(ref_mc), rtol=1e-5, atol=1e-5)
    assert out_mc.shape == (B, MC)

    print("KERNEL_OK")
</pallas_src>

<mosaic_0001>
module attributes {stable_mosaic.version = 11 : i64} {
  func.func @_lpm_kernel(%arg0: i32, %arg1: i32, %arg2: memref<2x4x256xf32, #tpu.memory_space<vmem>>, %arg3: memref<2x4x256xf32, #tpu.memory_space<vmem>>, %arg4: memref<2x1x256xf32, #tpu.memory_space<vmem>>, %arg5: memref<2x1xf32, #tpu.memory_space<vmem>>, %arg6: memref<2x1xf32, #tpu.memory_space<vmem>>, %arg7: memref<2x1xf32, #tpu.memory_space<vmem>>) attributes {dimension_semantics = [#tpu.dimension_semantics<parallel>, #tpu.dimension_semantics<arbitrary>], iteration_bounds = array<i64: 1, 1>, scalar_prefetch = 0 : i64, scratch_operands = 2 : i64, tpu.core_type = #tpu.core_type<tc>, window_params = [{transform_indices = @transform_0, window_bounds = array<i64: 2, 4, 256>}, {transform_indices = @transform_1, window_bounds = array<i64: 2, 4, 256>}, {transform_indices = @transform_2, window_bounds = array<i64: 2, 1, 256>}, {transform_indices = @transform_3, window_bounds = array<i64: 2, 1>}]} {
    %c0_i32 = arith.constant 0 : i32
    %0 = arith.cmpi eq, %arg1, %c0_i32 : i32
    %1 = arith.extui %0 : i1 to i32
    %c0_i32_0 = arith.constant 0 : i32
    %2 = arith.cmpi ne, %1, %c0_i32_0 : i32
    scf.if %2 {
      %cst_23 = arith.constant 0.000000e+00 : f32
      %32 = vector.broadcast %cst_23 : f32 to vector<2x1xf32>
      %c0_24 = arith.constant 0 : index
      %c0_25 = arith.constant 0 : index
      %33 = vector.load %arg6[%c0_24, %c0_25] : memref<2x1xf32, #tpu.memory_space<vmem>>, vector<2x1xf32>
      tpu.vector_store %arg6[%c0_24, %c0_25], %32 {strides = array<i32>} : memref<2x1xf32, #tpu.memory_space<vmem>>, vector<2x1xf32>,
      %cst_26 = arith.constant 0.000000e+00 : f32
      %34 = vector.broadcast %cst_26 : f32 to vector<2x1xf32>
      %c0_27 = arith.constant 0 : index
      %c0_28 = arith.constant 0 : index
      %35 = vector.load %arg7[%c0_27, %c0_28] : memref<2x1xf32, #tpu.memory_space<vmem>>, vector<2x1xf32>
      tpu.vector_store %arg7[%c0_27, %c0_28], %34 {strides = array<i32>} : memref<2x1xf32, #tpu.memory_space<vmem>>, vector<2x1xf32>,
    } else {
    }
    %c0 = arith.constant 0 : index
    %c0_1 = arith.constant 0 : index
    %c0_2 = arith.constant 0 : index
    %3 = vector.load %arg2[%c0, %c0_1, %c0_2] : memref<2x4x256xf32, #tpu.memory_space<vmem>>, vector<2x4x256xf32>
    %c0_3 = arith.constant 0 : index
    %c0_4 = arith.constant 0 : index
    %c0_5 = arith.constant 0 : index
    %4 = vector.load %arg3[%c0_3, %c0_4, %c0_5] : memref<2x4x256xf32, #tpu.memory_space<vmem>>, vector<2x4x256xf32>
    %c0_6 = arith.constant 0 : index
    %c0_7 = arith.constant 0 : index
    %c0_8 = arith.constant 0 : index
    %5 = vector.load %arg4[%c0_6, %c0_7, %c0_8] : memref<2x1x256xf32, #tpu.memory_space<vmem>>, vector<2x1x256xf32>
    %6 = vector.shape_cast %5 : vector<2x1x256xf32> to vector<2x256xf32>
    %cst = arith.constant 0.000000e+00 : f32
    %7 = vector.broadcast %cst : f32 to vector<2x4x256xf32>
    %8 = arith.maximumf %4, %7 : vector<2x4x256xf32>
    %9 = math.absf %4 : vector<2x4x256xf32>
    %cst_9 = arith.constant 0.000000e+00 : f32
    %10 = vector.broadcast %cst_9 : f32 to vector<2x4x256xf32>
    %11 = arith.subf %10, %9 : vector<2x4x256xf32>
    %12 = math.exp %11 : vector<2x4x256xf32>
    %13 = math.log1p %12 : vector<2x4x256xf32>
    %14 = arith.addf %8, %13 : vector<2x4x256xf32>
    %15 = arith.mulf %3, %4 : vector<2x4x256xf32>
    %16 = arith.subf %15, %14 : vector<2x4x256xf32>
    %cst_10 = arith.constant dense<0.000000e+00> : vector<2x256xf32>
    %17 = vector.multi_reduction <add>, %16, %cst_10 [1] : vector<2x4x256xf32> to vector<2x256xf32>
    %18 = arith.mulf %17, %6 : vector<2x256xf32>
    %cst_11 = arith.constant dense<0.000000e+00> : vector<2xf32>
    %19 = vector.multi_reduction <add>, %18, %cst_11 [1] : vector<2x256xf32> to vector<2xf32>
    %20 = vector.shape_cast %19 : vector<2xf32> to vector<2x1xf32>
    %cst_12 = arith.constant dense<0.000000e+00> : vector<2xf32>
    %21 = vector.multi_reduction <add>, %6, %cst_12 [1] : vector<2x256xf32> to vector<2xf32>
    %22 = vector.shape_cast %21 : vector<2xf32> to vector<2x1xf32>
    %c0_13 = arith.constant 0 : index
    %c0_14 = arith.constant 0 : index
    %23 = vector.load %arg6[%c0_13, %c0_14] : memref<2x1xf32, #tpu.memory_space<vmem>>, vector<2x1xf32>
    %24 = arith.addf %23, %20 : vector<2x1xf32>
    %c0_15 = arith.constant 0 : index
    %c0_16 = arith.constant 0 : index
    %25 = vector.load %arg6[%c0_15, %c0_16] : memref<2x1xf32, #tpu.memory_space<vmem>>, vector<2x1xf32>
    tpu.vector_store %arg6[%c0_15, %c0_16], %24 {strides = array<i32>} : memref<2x1xf32, #tpu.memory_space<vmem>>, vector<2x1xf32>,
    %c0_17 = arith.constant 0 : index
    %c0_18 = arith.constant 0 : index
    %26 = vector.load %arg7[%c0_17, %c0_18] : memref<2x1xf32, #tpu.memory_space<vmem>>, vector<2x1xf32>
    %27 = arith.addf %26, %22 : vector<2x1xf32>
    %c0_19 = arith.constant 0 : index
    %c0_20 = arith.constant 0 : index
    %28 = vector.load %arg7[%c0_19, %c0_20] : memref<2x1xf32, #tpu.memory_space<vmem>>, vector<2x1xf32>
    tpu.vector_store %arg7[%c0_19, %c0_20], %27 {strides = array<i32>} : memref<2x1xf32, #tpu.memory_space<vmem>>, vector<2x1xf32>,
    %c0_i32_21 = arith.constant 0 : i32
    %29 = arith.cmpi eq, %arg1, %c0_i32_21 : i32
    %30 = arith.extui %29 : i1 to i32
    %c0_i32_22 = arith.constant 0 : i32
    %31 = arith.cmpi ne, %30, %c0_i32_22 : i32
    scf.if %31 {
      %c0_23 = arith.constant 0 : index
      %c0_24 = arith.constant 0 : index
      %32 = vector.load %arg6[%c0_23, %c0_24] : memref<2x1xf32, #tpu.memory_space<vmem>>, vector<2x1xf32>
      %c0_25 = arith.constant 0 : index
      %c0_26 = arith.constant 0 : index
      %33 = vector.load %arg7[%c0_25, %c0_26] : memref<2x1xf32, #tpu.memory_space<vmem>>, vector<2x1xf32>
      %34 = arith.divf %32, %33 : vector<2x1xf32>
      %c0_27 = arith.constant 0 : index
      %c0_28 = arith.constant 0 : index
      %35 = vector.load %arg5[%c0_27, %c0_28] : memref<2x1xf32, #tpu.memory_space<vmem>>, vector<2x1xf32>
      tpu.vector_store %arg5[%c0_27, %c0_28], %34 {strides = array<i32>} : memref<2x1xf32, #tpu.memory_space<vmem>>, vector<2x1xf32>,
    } else {
    }
    return
  }
  func.func @transform_0(%arg0: i32, %arg1: i32) -> (i32, i32, i32) {
    %c0_i32 = arith.constant 0 : i32
    %c0_i32_0 = arith.constant 0 : i32
    return %arg0, %c0_i32, %arg1 : i32, i32, i32
  }
  func.func @transform_1(%arg0: i32, %arg1: i32) -> (i32, i32, i32) {
    %c0_i32 = arith.constant 0 : i32
    %c0_i32_0 = arith.constant 0 : i32
    return %arg0, %c0_i32, %arg1 : i32, i32, i32
  }
  func.func @transform_2(%arg0: i32, %arg1: i32) -> (i32, i32, i32) {
    %c0_i32 = arith.constant 0 : i32
    %c0_i32_0 = arith.constant 0 : i32
    return %arg0, %c0_i32, %arg1 : i32, i32, i32
  }
  func.func @transform_3(%arg0: i32, %arg1: i32) -> (i32, i32) {
    %c0_i32 = arith.constant 0 : i32
    %c0_i32_0 = arith.constant 0 : i32
    return %arg0, %c0_i32 : i32, i32
  }
}

</mosaic_0001>

<bundles_post_ra>
// kernel: tpu_custom_call.1
= control target key start
LH: loop header
LB: loop body
LE: loop exit
PB: predicated region body
PF: predicated region fallthrough
CT: control target
= control target key end

     0   :  { %8 = vsyncpa [#allocation5], 0  ;;  %s365_s0 = inlined_call_operand.hbm [shape: f32[2,4,256], index: 0, kind: input, shape index: {}]   ;;  %s366_s1 = inlined_call_operand.hbm [shape: f32[2,4,256], index: 1, kind: input, shape index: {}]   ;;  %s367_s2 = inlined_call_operand.vmem [shape: f32[2,1,256], index: 2, kind: input, shape index: {}]   ;;  %s368_s3 = inlined_call_operand.vmem [shape: f32[2,1], index: 3, kind: output, shape index: {}]  }
   0x1   :  { %9 = vsyncpa [#allocation7], 0  ;;  %s282_s12 = smov [#allocation4]   ;;  %s234_s16 = scalar_lea.hbm %s365_s0, 256 }
   0x2   :  { %s15_s13 = sshll.u32 %s282_s12, 4  ;;  %p235_p0 = scmp.ne.s32.totalorder %s365_s0, %s234_s16  ;;  %s16_s13 = int_to_ptr.vmem [resolvable:$true] %s15_s13 }
   0x3   :  { %p238_p1 = scmp.lt.u32.totalorder %s234_s16, %s365_s0 }
   0x5   :  { %p240_p2 = pnand %p238_p1, %p235_p0 }
   0x7   :  { %243 = shalt.err (!%p240_p2)
}
   0x8   :  { %s244_s21 = scalar_lea.vmem %s16_s13, 256  ;;  %p249_p4 = scmp.lt.s32.totalorder %s16_s13, %s16_s13 }
   0x9   :  { %p245_p3 = scmp.ne.s32.totalorder %s16_s13, %s244_s21  ;;  %p250_p5 = scmp.lt.s32.totalorder %s244_s21, %s244_s21 }
   0xb   :  { %p251_p6 = por %p250_p5, %p249_p4 }
   0xd   :  { %p252_p7 = pnand %p251_p6, %p245_p3 }
   0xf   :  { %255 = shalt.err (!%p252_p7)
}
  0x10   :  { %s283_s22 = smov 128   ;;  %s284_s23 = smov 8  }
  0x11   :  { %21 = dma.hbm_to_vmem [thread:$0]  %s365_s0, 256, %s16_s13, [#allocation5], %s283_s22, %s283_s22, %s284_s23  }
  0x12   :  { %s285_s26 = smov [#allocation6]   ;;  %s256_s30 = scalar_lea.hbm %s366_s1, 256 }
  0x13   :  { %s27_s27 = sshll.u32 %s285_s26, 4  ;;  %p257_p8 = scmp.ne.s32.totalorder %s366_s1, %s256_s30  ;;  %s28_s27 = int_to_ptr.vmem [resolvable:$true] %s27_s27 }
  0x14   :  { %p260_p9 = scmp.lt.u32.totalorder %s256_s30, %s366_s1 }
  0x16   :  { %p262_p10 = pnand %p260_p9, %p257_p8 }
  0x18   :  { %265 = shalt.err (!%p262_p10)
}
  0x19   :  { %s266_s8 = scalar_lea.vmem %s28_s27, 256  ;;  %p271_p12 = scmp.lt.s32.totalorder %s28_s27, %s28_s27 }
  0x1a   :  { %p267_p11 = scmp.ne.s32.totalorder %s28_s27, %s266_s8  ;;  %p272_p13 = scmp.lt.s32.totalorder %s266_s8, %s266_s8 }
  0x1c   :  { %p273_p0 = por %p272_p13, %p271_p12 }
  0x1e   :  { %p274_p1 = pnand %p273_p0, %p267_p11 }
  0x20   :  { %277 = shalt.err (!%p274_p1)
}
  0x21   :  { %33 = dma.hbm_to_vmem [thread:$0]  %s366_s1, 256, %s28_s27, [#allocation7], %s283_s22, %s283_s22, %s284_s23  }
  0x22   :  { %278 = dma.done.wait [#allocation5], 256  }
  0x23   :  { %279 = vsyncadd [#allocation5], 4294967040 }
  0x24   :  { %280 = dma.done.wait [#allocation7], 256  }
  0x25   :  { %281 = vsyncadd [#allocation7], 4294967040  ;;  %v126_v0 = vlaneseq  ;;  %v286_v1 = vmov 1966171168   ;;  %vm46_vm0 = vcmask 1024   ;;  %v287_v4 = vmov 0.0  }
  0x26   :  { %v169_v2 = vunpack.c.l.s4 %v286_v1  ;;  %48 = vst.msk [vmem:[#allocation3] sm:$0x3] %vm46_vm0, %v287_v4  ;;  %47 = vst.msk [vmem:[#allocation2] sm:$0x3] %vm46_vm0, %v287_v4  ;;  %v340_v7 = vld [vmem:[%s367_s2] sm:$0x3] }
  0x27   :  { %v332_v3 = vshrl.u32 %v126_v0, 7  ;;  %v345_v8 = vld [vmem:[%s367_s2 + $0x2] sm:$0x3]  ;;  %v51_v10 = vld [vmem:[#allocation6] sm:$0xff]  ;;  %vm161_vm1 = vcmask 1041408   ;;  %v49_v35 = vld [vmem:[#allocation4] sm:$0xff] }
  0x28   :  { %v170_v5 = vunpack.c.0.s8 %v169_v2  ;;  %v167_v9 = vcombine.low %v340_v7, %v345_v8  ;;  %v52_v11 = vld [vmem:[#allocation6 + $0x8] sm:$0xff]  ;;  %v57_v12 = vand.u32 2147483647, %v51_v10  ;;  %v50_v38 = vld [vmem:[#allocation4 + $0x8] sm:$0xff]  ;;  %v55_v39 = vmax.f32 %v51_v10, 0.0 }
  0x29   :  { %v58_v13 = vand.u32 2147483647, %v52_v11  ;;  %v56_v42 = vmax.f32 %v52_v11, 0.0  ;;  %v85_v45 = vmul.f32 %v51_v10, %v49_v35  ;;  %v86_v47 = vmul.f32 %v52_v11, %v50_v38 }
  0x2a   :  { %v173_v6 = vsub.s32 %v170_v5, %v332_v3  ;;  %v59_v15 = vsub.f32 0.0, %v57_v12  ;;  %vm95_vm4 = vcmask 1043456   ;;  %vm155_vm5 = vcmask 1041409  }
  0x2b   :  { %v60_v16 = vsub.f32 0.0, %v58_v13  ;;  %v132_v13 = vsub.s32 1, %v332_v3 }
  0x2c   :  { %v174_v14 = vrot.slane %v167_v9, %v173_v6  ;;  %v61_v19 = vmul.f32 1.442695, %v59_v15 }
  0x2d   :  { %v63_v20 = vmul.f32 1.442695, %v60_v16 }
  0x2e   :  { %v175_v17 = vcombine.high %v174_v14, %v174_v14  ;;  %v182_v18 = vrot.slane %v174_v14, %v173_v6  ;;  %224 = vpow2.f32 %v61_v19 }
  0x2f   :  { %226 = vpow2.f32 %v63_v20 }
  0x30   :  { %v189_v21 = vrot.slane %v175_v17, %v173_v6  ;;  %v192_v22 = vsel %vm161_vm1, %v182_v18, 0.0  ;;  %v128_v6 = vsub.s32 0, %v332_v3 }
  0x32   :  { %v193_v23 = vsel %vm161_vm1, %v189_v21, 0.0  ;;  %v129_v18 = vrot.slane %v340_v7, %v128_v6  ;;  %v137_v19 = vrot.slane %v345_v8, %v128_v6 }
  0x33   :  { %v194_v24 = vadd.f32 %v193_v23, %v192_v22 }
  0x35   :  { %195 = vadd.xlane.f32.xlu0 %v194_v24  ;;  %v133_v24 = vrot.slane %v340_v7, %v132_v13  ;;  %v201_v7 = vld [vmem:[#allocation3] sm:$0x3] }
  0x38   :  { %v225_v25 = vpop.eup %224 }
  0x39   :  { %v227_v26 = vpop.eup %226  ;;  %v65_v27 = vadd.f32 1.0, %v225_v25  ;;  %v68_v29 = vmul.f32 -0.5, %v225_v25  ;;  %v71_v32 = vand.u32 2147483647, %v225_v25 }
  0x3a   :  { %v74_v28 = vadd.f32 1.0, %v227_v26  ;;  %v77_v30 = vmul.f32 -0.5, %v227_v26  ;;  %v80_v34 = vand.u32 2147483647, %v227_v26 }
  0x3b   :  { %228 = vlog2.f32 %v65_v27  ;;  %v69_v31 = vadd.f32 1.0, %v68_v29  ;;  %vm72_vm2 = vcmp.lt.f32.partialorder %v71_v32, 0.0004427343 }
  0x3c   :  { %230 = vlog2.f32 %v74_v28  ;;  %v78_v33 = vadd.f32 1.0, %v77_v30  ;;  %vm81_vm3 = vcmp.lt.f32.partialorder %v80_v34, 0.0004427343 }
  0x3d   :  { %v70_v36 = vmul.f32 %v225_v25, %v69_v31  ;;  %v141_v25 = vrot.slane %v345_v8, %v132_v13 }
  0x3e   :  { %v79_v40 = vmul.f32 %v227_v26, %v78_v33 }
  0x45   :  { %v229_v37 = vpop.eup %228 }
  0x46   :  { %v231_v41 = vpop.eup %230  ;;  %v67_v43 = vmul.f32 0.6931472, %v229_v37 }
  0x47   :  { %v76_v44 = vmul.f32 0.6931472, %v231_v41 }
  0x48   :  { %v73_v46 = vsel %vm72_vm2, %v70_v36, %v67_v43 }
  0x49   :  { %v82_v48 = vsel %vm81_vm3, %v79_v40, %v76_v44  ;;  %v83_v49 = vadd.f32 %v73_v46, %v55_v39  ;;  %v197_v40 = vld [vmem:[#allocation2] sm:$0x3] }
  0x4a   :  { %v84_v50 = vadd.f32 %v82_v48, %v56_v42 }
  0x4b   :  { %v87_v51 = vsub.f32 %v85_v45, %v83_v49 }
  0x4c   :  { %v88_v52 = vsub.f32 %v86_v47, %v84_v50 }
  0x4d   :  { %v91_v53 = vcombine.high %v87_v51, %v87_v51  ;;  %v96_v54 = vsel %vm95_vm4, %v87_v51, 0.0 }
  0x4e   :  { %v92_v55 = vcombine.high %v88_v52, %v88_v52  ;;  %v97_v56 = vrot.slane %v96_v54, 4  ;;  %v110_v57 = vsel %vm95_vm4, %v88_v52, 0.0 }
  0x4f   :  { %v103_v58 = vsel %vm95_vm4, %v91_v53, 0.0  ;;  %v111_v59 = vrot.slane %v110_v57, 4 }
  0x50   :  { %v98_v60 = vadd.f32 %v97_v56, %v96_v54  ;;  %v104_v61 = vrot.slane %v103_v58, 4  ;;  %v117_v62 = vsel %vm95_vm4, %v92_v55, 0.0 }
  0x51   :  { %v112_v63 = vadd.f32 %v111_v59, %v110_v57  ;;  %v118_v0 = vrot.slane %v117_v62, 4 }
  0x52   :  { %v99_v1 = vrot.slane %v98_v60, 2  ;;  %v105_v2 = vadd.f32 %v104_v61, %v103_v58 }
  0x53   :  { %v113_v4 = vrot.slane %v112_v63, 2  ;;  %v119_v5 = vadd.f32 %v118_v0, %v117_v62 }
  0x54   :  { %v100_v9 = vadd.f32 %v99_v1, %v98_v60  ;;  %v106_v10 = vrot.slane %v105_v2, 2 }
  0x55   :  { %v114_v11 = vadd.f32 %v113_v4, %v112_v63  ;;  %v120_v12 = vrot.slane %v119_v5, 2 }
  0x56   :  { %v101_v14 = vrot.slane %v100_v9, 1  ;;  %v107_v15 = vadd.f32 %v106_v10, %v105_v2 }
  0x57   :  { %v115_v16 = vrot.slane %v114_v11, 1  ;;  %v121_v17 = vadd.f32 %v120_v12, %v119_v5 }
  0x58   :  { %v102_v20 = vadd.f32 %v101_v14, %v100_v9  ;;  %v108_v21 = vrot.slane %v107_v15, 1 }
  0x59   :  { %v116_v22 = vadd.f32 %v115_v16, %v114_v11  ;;  %v122_v23 = vrot.slane %v121_v17, 1 }
  0x5a   :  { %v109_v26 = vadd.f32 %v108_v21, %v107_v15  ;;  %v146_v28 = vmul.f32 %v129_v18, %v102_v20 }
  0x5b   :  { %v123_v27 = vadd.f32 %v122_v23, %v121_v17  ;;  %v148_v3 = vmul.f32 %v137_v19, %v116_v22 }
  0x5c   :  { %v147_v29 = vmul.f32 %v133_v24, %v109_v26 }
  0x5d   :  { %v149_v30 = vmul.f32 %v141_v25, %v123_v27  ;;  %v154_v31 = vrot.slane %v148_v3, 7 }
  0x5f   :  { %v156_v32 = vsel %vm155_vm5, %v154_v31, %v146_v28  ;;  %v157_v33 = vrot.slane %v149_v30, 7 }
  0x60   :  { %v162_v34 = vsel %vm161_vm1, %v156_v32, 0.0 }
  0x61   :  { %v158_v35 = vsel %vm155_vm5, %v157_v33, %v147_v29 }
  0x62   :  { %v163_v36 = vsel %vm161_vm1, %v158_v35, 0.0 }
  0x63   :  { %v164_v37 = vadd.f32 %v163_v36, %v162_v34 }
  0x65   :  { %165 = vadd.xlane.f32.xlu0 %v164_v37 }
  0xc2   :  { %v196_v38 = vpop.xlane.xlu0 %195 }
  0xc3   :  { %v202_v8 = vadd.f32 %v201_v7, %v196_v38 }
  0xc5   :  { %203 = vst.msk [vmem:[#allocation3] sm:$0x3] %vm46_vm0, %v202_v8 }
  0xcc   :  { %v208_v39 = vld [vmem:[#allocation3] sm:$0x3] }
  0xcd   :  { %232 = vrcp.f32 %v208_v39 }
  0xd7   :  { %v233_v43 = vpop.eup %232 }
  0xf2   :  { %v166_v41 = vpop.xlane.xlu0 %165 }
  0xf3   :  { %v198_v42 = vadd.f32 %v197_v40, %v166_v41 }
  0xf5   :  { %200 = vst.msk [vmem:[#allocation2] sm:$0x3] %vm46_vm0, %v198_v42 }
  0xfc   :  { %v207_v44 = vld [vmem:[#allocation2] sm:$0x3] }
  0xfd   :  { %v210_v45 = vmul.f32 %v233_v43, %v207_v44 }
  0xff   :  { %211 = vst.msk [vmem:[%s368_s3] sm:$0x3] %vm46_vm0, %v210_v45 }
 0x100   :  { %216 = vsyncpa [#allocation5], 1 }
 0x101   :  { %217 = vsyncpa [#allocation7], 1 }

</bundles_post_ra>
